<compile_context>
chip_gen: v7x
topology: tpu7x:2x2x1
jax: 0.10.0
libtpu: 0.0.40
codegen_flags: <defaults>
</compile_context>

<pallas_src>
import functools

import jax
import jax.numpy as jnp
from jax.experimental import pallas as pl
from jax.experimental.pallas import tpu as pltpu


def _round_up(x: int, m: int) -> int:
    return ((x + m - 1) // m) * m


def _linear_sigmoid_kernel(x_ref, w_ref, b_ref, o_ref, acc_ref):
    # x_ref: (tm, tk)  w_ref: (tn, tk)  b_ref: (1, tn)  o_ref: (tm, tn)
    k = pl.program_id(2)

    @pl.when(k == 0)
    def _init():
        acc_ref[...] = jnp.zeros_like(acc_ref)

    # Contract last axes of x and w directly on the MXU (no explicit transpose).
    acc_ref[...] += jax.lax.dot_general(
        x_ref[...],
        w_ref[...],
        dimension_numbers=(((1,), (1,)), ((), ())),
        preferred_element_type=jnp.float32,
    )

    @pl.when(k == pl.num_programs(2) - 1)
    def _finalize():
        y = acc_ref[...] + b_ref[...]          # broadcast (1, tn) over batch
        # sigmoid(y) = 0.5 * (tanh(0.5*y) + 1)  -> EUP tanh, numerically stable
        o_ref[...] = (0.5 * (jnp.tanh(0.5 * y) + 1.0)).astype(o_ref.dtype)


@functools.partial(jax.jit, static_argnames=("tm_max", "tn_max", "tk_max"))
def binary_model_forward(x, w, b, *, tm_max=256, tn_max=256, tk_max=512):
    """x: (B, n_in) f32, w: (n_out, n_in) f32 (PyTorch layout), b: (n_out,) f32
    -> sigmoid(x @ w.T + b), shape (B, n_out) f32."""
    B, n_in = x.shape
    n_out = w.shape[0]

    # Tile sizes: (8,128)-aligned, capped so double-buffered tiles stay far
    # under the v7x 64 MiB VMEM budget (and trivially fit v5e/v6e).
    tm = min(tm_max, _round_up(B, 8))
    tn = min(tn_max, _round_up(n_out, 128))
    tk = min(tk_max, _round_up(n_in, 128))

    # Pad to whole tiles (lane-dense output, full unmasked stores).
    Bp = _round_up(B, tm)
    Np = _round_up(n_out, tn)
    Kp = _round_up(n_in, tk)

    x_p = jnp.zeros((Bp, Kp), x.dtype).at[:B, :n_in].set(x)
    w_p = jnp.zeros((Np, Kp), w.dtype).at[:n_out, :n_in].set(w)
    b_p = jnp.zeros((1, Np), b.dtype).at[0, :n_out].set(b)

    grid = (Bp // tm, Np // tn, Kp // tk)

    out_p = pl.pallas_call(
        _linear_sigmoid_kernel,
        out_shape=jax.ShapeDtypeStruct((Bp, Np), x.dtype),
        grid_spec=pltpu.PrefetchScalarGridSpec(
            num_scalar_prefetch=0,
            grid=grid,
            in_specs=[
                pl.BlockSpec((tm, tk), lambda i, j, k: (i, k)),   # x tile
                pl.BlockSpec((tn, tk), lambda i, j, k: (j, k)),   # w tile (N,K)
                pl.BlockSpec((1, tn), lambda i, j, k: (0, j)),    # bias tile
            ],
            out_specs=pl.BlockSpec((tm, tn), lambda i, j, k: (i, j)),
            scratch_shapes=[pltpu.VMEM((tm, tn), jnp.float32)],
        ),
        compiler_params=pltpu.CompilerParams(
            dimension_semantics=("parallel", "parallel", "arbitrary"),
        ),
    )(x_p, w_p, b_p)

    return out_p[:B, :n_out]


if __name__ == "__main__":
    # Small shapes consistent with nn.Linear(n_in, n_out): batch=8, n_in=32, n_out=8
    B, n_in, n_out = 8, 32, 8

    key = jax.random.PRNGKey(0)
    kx, kw, kb = jax.random.split(key, 3)

    # PyTorch-style uniform(-1/sqrt(n_in), 1/sqrt(n_in)) init
    bound = 1.0 / jnp.sqrt(jnp.float32(n_in))
    w = jax.random.uniform(kw, (n_out, n_in), jnp.float32, -bound, bound)
    b = jax.random.uniform(kb, (n_out,), jnp.float32, -bound, bound)
    x = jax.random.normal(kx, (B, n_in), jnp.float32)

    out = binary_model_forward(x, w, b)
    out = jax.block_until_ready(out)

    # Reference check against plain JAX
    ref = jax.nn.sigmoid(x @ w.T + b)
    assert out.shape == (B, n_out)
    assert jnp.allclose(out, ref, atol=1e-5, rtol=1e-5), float(
        jnp.max(jnp.abs(out - ref))
    )

    print("KERNEL_OK")
</pallas_src>

<mosaic_0001>
module attributes {stable_mosaic.version = 11 : i64} {
  func.func @_linear_sigmoid_kernel(%arg0: i32, %arg1: i32, %arg2: i32, %arg3: memref<8x128xf32, #tpu.memory_space<vmem>>, %arg4: memref<128x128xf32, #tpu.memory_space<vmem>>, %arg5: memref<1x128xf32, #tpu.memory_space<vmem>>, %arg6: memref<8x128xf32, #tpu.memory_space<vmem>>, %arg7: memref<8x128xf32, #tpu.memory_space<vmem>>) attributes {dimension_semantics = [#tpu.dimension_semantics<parallel>, #tpu.dimension_semantics<parallel>, #tpu.dimension_semantics<arbitrary>], iteration_bounds = array<i64: 1, 1, 1>, scalar_prefetch = 0 : i64, scratch_operands = 1 : i64, tpu.core_type = #tpu.core_type<tc>, window_params = [{transform_indices = @transform_0, window_bounds = array<i64: 8, 128>}, {transform_indices = @transform_1, window_bounds = array<i64: 128, 128>}, {transform_indices = @transform_2, window_bounds = array<i64: 1, 128>}, {transform_indices = @transform_3, window_bounds = array<i64: 8, 128>}]} {
    %c0_i32 = arith.constant 0 : i32
    %0 = arith.cmpi eq, %arg2, %c0_i32 : i32
    %1 = arith.extui %0 : i1 to i32
    %c0_i32_0 = arith.constant 0 : i32
    %2 = arith.cmpi ne, %1, %c0_i32_0 : i32
    scf.if %2 {
      %cst_10 = arith.constant 0.000000e+00 : f32
      %12 = vector.broadcast %cst_10 : f32 to vector<8x128xf32>
      %c0_11 = arith.constant 0 : index
      %c0_12 = arith.constant 0 : index
      %13 = vector.load %arg7[%c0_11, %c0_12] : memref<8x128xf32, #tpu.memory_space<vmem>>, vector<8x128xf32>
      tpu.vector_store %arg7[%c0_11, %c0_12], %12 {strides = array<i32>} : memref<8x128xf32, #tpu.memory_space<vmem>>, vector<8x128xf32>,
    } else {
    }
    %c0 = arith.constant 0 : index
    %c0_1 = arith.constant 0 : index
    %3 = vector.load %arg7[%c0, %c0_1] : memref<8x128xf32, #tpu.memory_space<vmem>>, vector<8x128xf32>
    %c0_2 = arith.constant 0 : index
    %c0_3 = arith.constant 0 : index
    %4 = vector.load %arg3[%c0_2, %c0_3] : memref<8x128xf32, #tpu.memory_space<vmem>>, vector<8x128xf32>
    %c0_4 = arith.constant 0 : index
    %c0_5 = arith.constant 0 : index
    %5 = vector.load %arg4[%c0_4, %c0_5] : memref<128x128xf32, #tpu.memory_space<vmem>>, vector<128x128xf32>
    %cst = arith.constant dense<0.000000e+00> : vector<8x128xf32>
    %6 = tpu.matmul %4, %5, %cst {dimension_numbers = #tpu.dot_dimension_numbers<[1], [1], [0], [0], [0, 0, 1, 0], [], []>} : vector<8x128xf32>, vector<128x128xf32>, vector<8x128xf32> -> vector<8x128xf32>
    %7 = arith.addf %3, %6 : vector<8x128xf32>
    %c0_6 = arith.constant 0 : index
    %c0_7 = arith.constant 0 : index
    %8 = vector.load %arg7[%c0_6, %c0_7] : memref<8x128xf32, #tpu.memory_space<vmem>>, vector<8x128xf32>
    tpu.vector_store %arg7[%c0_6, %c0_7], %7 {strides = array<i32>} : memref<8x128xf32, #tpu.memory_space<vmem>>, vector<8x128xf32>,
    %c0_i32_8 = arith.constant 0 : i32
    %9 = arith.cmpi eq, %arg2, %c0_i32_8 : i32
    %10 = arith.extui %9 : i1 to i32
    %c0_i32_9 = arith.constant 0 : i32
    %11 = arith.cmpi ne, %10, %c0_i32_9 : i32
    scf.if %11 {
      %c0_10 = arith.constant 0 : index
      %c0_11 = arith.constant 0 : index
      %12 = vector.load %arg7[%c0_10, %c0_11] : memref<8x128xf32, #tpu.memory_space<vmem>>, vector<8x128xf32>
      %c0_12 = arith.constant 0 : index
      %c0_13 = arith.constant 0 : index
      %13 = vector.load %arg5[%c0_12, %c0_13] : memref<1x128xf32, #tpu.memory_space<vmem>>, vector<1x128xf32>
      %14 = vector.broadcast %13 : vector<1x128xf32> to vector<8x128xf32>
      %15 = arith.addf %12, %14 : vector<8x128xf32>
      %cst_14 = arith.constant 5.000000e-01 : f32
      %16 = vector.broadcast %cst_14 : f32 to vector<8x128xf32>
      %17 = arith.mulf %16, %15 : vector<8x128xf32>
      %18 = math.tanh %17 : vector<8x128xf32>
      %cst_15 = arith.constant 1.000000e+00 : f32
      %19 = vector.broadcast %cst_15 : f32 to vector<8x128xf32>
      %20 = arith.addf %18, %19 : vector<8x128xf32>
      %cst_16 = arith.constant 5.000000e-01 : f32
      %21 = vector.broadcast %cst_16 : f32 to vector<8x128xf32>
      %22 = arith.mulf %21, %20 : vector<8x128xf32>
      %c0_17 = arith.constant 0 : index
      %c0_18 = arith.constant 0 : index
      %23 = vector.load %arg6[%c0_17, %c0_18] : memref<8x128xf32, #tpu.memory_space<vmem>>, vector<8x128xf32>
      tpu.vector_store %arg6[%c0_17, %c0_18], %22 {strides = array<i32>} : memref<8x128xf32, #tpu.memory_space<vmem>>, vector<8x128xf32>,
    } else {
    }
    return
  }
  func.func @transform_0(%arg0: i32, %arg1: i32, %arg2: i32) -> (i32, i32) {
    %c0_i32 = arith.constant 0 : i32
    return %arg0, %arg2 : i32, i32
  }
  func.func @transform_1(%arg0: i32, %arg1: i32, %arg2: i32) -> (i32, i32) {
    %c0_i32 = arith.constant 0 : i32
    return %arg1, %arg2 : i32, i32
  }
  func.func @transform_2(%arg0: i32, %arg1: i32, %arg2: i32) -> (i32, i32) {
    %c0_i32 = arith.constant 0 : i32
    %c0_i32_0 = arith.constant 0 : i32
    return %c0_i32, %arg1 : i32, i32
  }
  func.func @transform_3(%arg0: i32, %arg1: i32, %arg2: i32) -> (i32, i32) {
    %c0_i32 = arith.constant 0 : i32
    return %arg0, %arg1 : i32, i32
  }
}

</mosaic_0001>

<bundles_post_ra>
// kernel: binary_model_forward.1
= control target key start
LH: loop header
LB: loop body
LE: loop exit
PB: predicated region body
PF: predicated region fallthrough
CT: control target
= control target key end

     0   :  { %v248_v2 = vmov 0.0|0.0   ;;  %vm249_vm0 = vmmov 0   ;;  %v250_v4 = vmov 0.0   ;;  %s338_s0 = inlined_call_operand.vmem [shape: f32[8,128], index: 0, kind: input, shape index: {}]   ;;  %s339_s1 = inlined_call_operand.vmem [shape: f32[128,128], index: 1, kind: input, shape index: {}]   ;;  %s340_s2 = inlined_call_operand.vmem [shape: f32[1,128], index: 2, kind: input, shape index: {}]   ;;  %s341_s3 = inlined_call_operand.hbm [shape: f32[8,128], index: 3, kind: output, shape index: {}]  }
   0x1   :  { %v22_v0 = vld [vmem:[%s339_s1] sm:$0xff]  ;;  %v23_v1 = vld [vmem:[%s339_s1 + $0x8] sm:$0xff]  ;;  %194 = vmatprep.subr.bf16.mxu0 %v248_v2  ;;  %191 = vmatprep.mubr.msk.f32.mxu0 %vm249_vm0, %v250_v4  ;;  %v24_v5 = vld [vmem:[%s339_s1 + $0x10] sm:$0xff] }
   0x2   :  { %v195_v3 = vpack.c.bf16 %v23_v1, %v22_v0  ;;  %v25_v6 = vld [vmem:[%s339_s1 + $0x18] sm:$0xff] }
   0x4   :  { %196 = vmatpush3.bf16.xpose.msra.mxu0 %v195_v3 }
   0x5   :  { %197 = vmatprep.subr.bf16.mxu0 %v248_v2 }
   0x6   :  { %8 = vsyncpa [#allocation4], 0  ;;  %v198_v7 = vpack.c.bf16 %v25_v6, %v24_v5  ;;  %v26_v8 = vld [vmem:[%s339_s1 + $0x20] sm:$0xff]  ;;  %v27_v9 = vld [vmem:[%s339_s1 + $0x28] sm:$0xff]  ;;  %s251_s21 = smov [#allocation3]  }
   0x7   :  { %v201_v10 = vpack.c.bf16 %v27_v9, %v26_v8  ;;  %v28_v11 = vld [vmem:[%s339_s1 + $0x30] sm:$0xff]  ;;  %v29_v12 = vld [vmem:[%s339_s1 + $0x38] sm:$0xff]  ;;  %v30_v14 = vld [vmem:[%s339_s1 + $0x40] sm:$0xff]  ;;  %s133_s22 = sshll.u32 %s251_s21, 4  ;;  %s134_s22 = int_to_ptr.vmem [resolvable:$true] %s133_s22 }
   0x8   :  { %v204_v13 = vpack.c.bf16 %v29_v12, %v28_v11  ;;  %v31_v15 = vld [vmem:[%s339_s1 + $0x48] sm:$0xff]  ;;  %v32_v17 = vld [vmem:[%s339_s1 + $0x50] sm:$0xff]  ;;  %v33_v18 = vld [vmem:[%s339_s1 + $0x58] sm:$0xff]  ;;  %p229_p1 = scmp.lt.s32.totalorder %s134_s22, %s134_s22 }
   0x9   :  { %v207_v16 = vpack.c.bf16 %v31_v15, %v30_v14  ;;  %v210_v19 = vpack.c.bf16 %v33_v18, %v32_v17  ;;  %v34_v20 = vld [vmem:[%s339_s1 + $0x60] sm:$0xff]  ;;  %v35_v21 = vld [vmem:[%s339_s1 + $0x68] sm:$0xff]  ;;  %v36_v23 = vld [vmem:[%s339_s1 + $0x70] sm:$0xff] }
   0xa   :  { %v213_v22 = vpack.c.bf16 %v35_v21, %v34_v20  ;;  %v37_v24 = vld [vmem:[%s339_s1 + $0x78] sm:$0xff]  ;;  %v21_v26 = vld [vmem:[%s338_s0] sm:$0xff]  ;;  %s224_s1 = scalar_lea.vmem %s134_s22, 128 }
   0xb   :  { %v216_v25 = vpack.c.bf16 %v37_v24, %v36_v23  ;;  %v141_v27 = vld [vmem:[%s340_s2] ss:$0 sm:$0xff]  ;;  %p225_p0 = scmp.ne.s32.totalorder %s134_s22, %s224_s1  ;;  %p230_p2 = scmp.lt.s32.totalorder %s224_s1, %s224_s1 }
   0xc   :  { %199 = vmatpush3.bf16.xpose.msra.mxu0 %v198_v7 }
   0xd   :  { %200 = vmatprep.subr.bf16.mxu0 %v248_v2  ;;  %p231_p3 = por %p230_p2, %p229_p1 }
   0xf   :  { %p232_p4 = pnand %p231_p3, %p225_p0 }
  0x14   :  { %202 = vmatpush3.bf16.xpose.msra.mxu0 %v201_v10 }
  0x15   :  { %203 = vmatprep.subr.bf16.mxu0 %v248_v2 }
  0x1c   :  { %205 = vmatpush3.bf16.xpose.msra.mxu0 %v204_v13 }
  0x1d   :  { %206 = vmatprep.subr.bf16.mxu0 %v248_v2 }
  0x24   :  { %208 = vmatpush3.bf16.xpose.msra.mxu0 %v207_v16 }
  0x25   :  { %209 = vmatprep.subr.bf16.mxu0 %v248_v2 }
  0x2c   :  { %211 = vmatpush3.bf16.xpose.msra.mxu0 %v210_v19 }
  0x2d   :  { %212 = vmatprep.subr.bf16.mxu0 %v248_v2 }
  0x34   :  { %214 = vmatpush3.bf16.xpose.msra.mxu0 %v213_v22 }
  0x35   :  { %215 = vmatprep.subr.bf16.mxu0 %v248_v2 }
  0x3c   :  { %217 = vmatpush3.bf16.xpose.msra.mxu0 %v216_v25 }
  0x43   :  { %192 = vmatmul.mubr.f32.vlgmr.msra.gmra.mrb[0].mxu0 %v21_v26 }
 0x116   :  { %v104_v28 = vpop.f32.mrb[0].mxu0 }
 0x117   :  { %v121_v29 = vadd.f32 %v141_v27, %v104_v28  ;;  %v193_v30 = vpop.f32.mrb[1].mxu0 }
 0x119   :  { %v122_v31 = vmul.f32 0.5, %v121_v29 }
 0x11b   :  { %222 = vtanh.f32 %v122_v31 }
 0x125   :  { %v223_v32 = vpop.eup %222 }
 0x126   :  { %v124_v33 = vadd.f32 1.0, %v223_v32 }
 0x128   :  { %v125_v34 = vmul.f32 0.5, %v124_v33 }
 0x12a   :  { %126 = vst [vmem:[#allocation3] sm:$0xff] %v125_v34 }
 0x12b   :  { %235 = shalt.err (!%p232_p4)
}
 0x12c   :  { %s236_s23 = scalar_lea.hbm %s341_s3, 128 }
 0x12d   :  { %p237_p5 = scmp.ne.s32.totalorder %s341_s3, %s236_s23  ;;  %p240_p6 = scmp.lt.u32.totalorder %s236_s23, %s341_s3 }
 0x12f   :  { %p242_p7 = pnand %p240_p6, %p237_p5 }
 0x131   :  { %245 = shalt.err (!%p242_p7)
}
 0x132   :  { %136 = dma.vmem_to_hbm [thread:$0]  %s134_s22, 128, %s341_s3, [#allocation4]  }
 0x133   :  { %246 = dma.done.wait [#allocation4], 128  }
 0x134   :  { %247 = vsyncadd [#allocation4], 4294967168 }
 0x135   :  { %140 = vsyncpa [#allocation4], 1 }

</bundles_post_ra>
